<compile_context>
chip_gen: v7x
topology: tpu7x:2x2x1
jax: 0.10.0
libtpu: 0.0.40
codegen_flags: <defaults>
</compile_context>

<pallas_src>
import functools

import jax
import jax.numpy as jnp
from jax.experimental import pallas as pl
from jax.experimental.pallas import tpu as pltpu


def _transformer_layer_kernel(x_ref, g1_ref, b1_ref, wqkv_ref, wo_ref, bo_ref,
                              g2_ref, b2_ref, w1_ref, fb1_ref, w2_ref, fb2_ref,
                              o_ref, ctx_ref, *, heads, bt, seq, approx_recip):
    D = x_ref.shape[-1]
    dh = D // heads
    scale = D ** (-0.5)          # matches the PyTorch module: dim ** -0.5
    eps = 1e-5
    mm_dtype = wqkv_ref.dtype    # matmul operand dtype (bf16 perf path / f32 exact path)

    x = x_ref[...].astype(jnp.float32)                       # (rb, D), rb = bt*seq

    # ---------------- Residual(PreNorm(Attention)) ----------------
    mu = jnp.mean(x, axis=-1, keepdims=True)
    var = jnp.mean((x - mu) ** 2, axis=-1, keepdims=True)
    xn = (x - mu) * jax.lax.rsqrt(var + eps) * g1_ref[...] + b1_ref[...]

    # single tall QKV projection: (rb, D) @ (D, 3D), f32 accumulation
    qkv = jnp.dot(xn.astype(mm_dtype), wqkv_ref[...],
                  preferred_element_type=jnp.float32)        # (rb, 3D)
    q = (qkv[:, 0 * D:1 * D] * scale).astype(mm_dtype)       # fold softmax scale into q
    k = qkv[:, 1 * D:2 * D].astype(mm_dtype)
    v = qkv[:, 2 * D:3 * D].astype(mm_dtype)

    # Attention scores/softmax/context are inherently per (batch element, head):
    # batch over the bt batch elements of this row block with rank-3 einsums,
    # compact static loop over heads.  Softmax math stays in f32.
    for h in range(heads):
        qh = q[:, h * dh:(h + 1) * dh].reshape(bt, seq, dh)
        kh = k[:, h * dh:(h + 1) * dh].reshape(bt, seq, dh)
        vh = v[:, h * dh:(h + 1) * dh].reshape(bt, seq, dh)
        dots = jnp.einsum('bqd,bkd->bqk', qh, kh,
                          preferred_element_type=jnp.float32)        # (bt, seq, seq)
        dots = dots - jnp.max(dots, axis=-1, keepdims=True)
        p = jnp.exp(dots)
        denom = jnp.sum(p, axis=-1, keepdims=True)
        p = p * pl.reciprocal(denom, approx=approx_recip)            # EUP reciprocal
        ctx = jnp.einsum('bqk,bkd->bqd', p.astype(mm_dtype), vh,
                         preferred_element_type=jnp.float32)         # (bt, seq, dh)
        ctx_ref[:, h * dh:(h + 1) * dh] = ctx.reshape(bt * seq, dh)

    # single tall output projection: (rb, D) @ (D, D)
    attn_out = jnp.dot(ctx_ref[...].astype(mm_dtype), wo_ref[...],
                       preferred_element_type=jnp.float32) + bo_ref[...]
    x = x + attn_out                                         # residual (f32)

    # ---------------- Residual(PreNorm(FeedForward)) ----------------
    mu2 = jnp.mean(x, axis=-1, keepdims=True)
    var2 = jnp.mean((x - mu2) ** 2, axis=-1, keepdims=True)
    xn2 = (x - mu2) * jax.lax.rsqrt(var2 + eps) * g2_ref[...] + b2_ref[...]
    h1 = jnp.dot(xn2.astype(mm_dtype), w1_ref[...],
                 preferred_element_type=jnp.float32) + fb1_ref[...]
    h1 = jnp.maximum(h1, 0.0)                                # ReLU
    ff = jnp.dot(h1.astype(mm_dtype), w2_ref[...],
                 preferred_element_type=jnp.float32) + fb2_ref[...]
    x = x + ff                                               # residual (f32)

    o_ref[...] = x.astype(o_ref.dtype)


def transformer_layer(x2d, p, heads, *, seq, matmul_dtype=jnp.bfloat16,
                      approx_recip=True):
    """One fused layer.  x2d is the row-flattened activation (B*seq, D)."""
    R, D = x2d.shape
    B = R // seq
    F = p["w1"].shape[1]

    # rows per grid step: whole batch elements, aiming for >=128 MXU rows per block
    bt = B
    for cand in range(1, B + 1):
        if B % cand == 0 and cand * seq >= 128:
            bt = cand
            break
    rb = bt * seq                       # rows per block (multiple of 8 since seq % 8 == 0)
    grid = (B // bt,)

    def fullspec(shape):
        return pl.BlockSpec(shape, lambda i, _s=len(shape): (0,) * _s)

    in_specs = [
        pl.BlockSpec((rb, D), lambda i: (i, 0)),   # x rows: one row block per step
        fullspec((1, D)), fullspec((1, D)),        # ln1 gamma / beta        (f32)
        fullspec((D, 3 * D)),                      # W_qkv                   (matmul dtype)
        fullspec((D, D)), fullspec((1, D)),        # W_out (matmul dtype), b_out (f32)
        fullspec((1, D)), fullspec((1, D)),        # ln2 gamma / beta        (f32)
        fullspec((D, F)), fullspec((1, F)),        # W1 (matmul dtype), b1   (f32)
        fullspec((F, D)), fullspec((1, D)),        # W2 (matmul dtype), b2   (f32)
    ]

    # explicit scoped-VMEM budget: double-buffered activation blocks + weights + scratch
    witem = jnp.dtype(matmul_dtype).itemsize
    wbytes = (D * 3 * D + D * D + D * F + F * D) * witem
    act_bytes = 2 * 2 * rb * D * x2d.dtype.itemsize          # in + out blocks, 2-deep
    scratch_bytes = rb * D * 4
    need = 2 * wbytes + act_bytes + scratch_bytes + (4 << 20)
    vmem_limit = int(min(64 << 20, max(32 << 20, need)))      # cap for v7x's 64 MiB VMEM

    mm = lambda w: w.astype(matmul_dtype)
    kernel = functools.partial(_transformer_layer_kernel, heads=heads, bt=bt,
                               seq=seq, approx_recip=approx_recip)

    return pl.pallas_call(
        kernel,
        out_shape=jax.ShapeDtypeStruct((R, D), x2d.dtype),
        grid=grid,
        in_specs=in_specs,
        out_specs=pl.BlockSpec((rb, D), lambda i: (i, 0)),
        scratch_shapes=[pltpu.VMEM((rb, D), jnp.float32)],     # assembled attention ctx
        compiler_params=pltpu.CompilerParams(
            dimension_semantics=("parallel",),
            vmem_limit_bytes=vmem_limit),
    )(x2d, p["g1"], p["b1"], mm(p["wqkv"]), mm(p["wo"]), p["bo"],
      p["g2"], p["b2"], mm(p["w1"]), p["fb1"], mm(p["w2"]), p["fb2"])


def transformer_forward(x, params, heads, *, matmul_dtype=jnp.bfloat16,
                        approx_recip=True):
    """Depth loop stays in plain JAX glue; each layer is one fused Pallas kernel."""
    B, N, D = x.shape
    x2 = x.reshape(B * N, D)            # lane-dense row-flattened layout for the kernel
    for p in params:
        x2 = transformer_layer(x2, p, heads, seq=N,
                               matmul_dtype=matmul_dtype, approx_recip=approx_recip)
    return x2.reshape(B, N, D)


# ---------------- deterministic parameter init (synthetic) ----------------
def init_params(key, depth, dim, heads, fc_dim):
    layers = []
    for d in range(depth):
        ks = jax.random.split(jax.random.fold_in(key, d), 7)
        layers.append(dict(
            g1=jnp.ones((1, dim), jnp.float32),
            b1=jnp.zeros((1, dim), jnp.float32),
            wqkv=0.05 * jax.random.normal(ks[0], (dim, 3 * dim), jnp.float32),
            wo=0.05 * jax.random.normal(ks[1], (dim, dim), jnp.float32),
            bo=0.05 * jax.random.normal(ks[2], (1, dim), jnp.float32),
            g2=jnp.ones((1, dim), jnp.float32),
            b2=jnp.zeros((1, dim), jnp.float32),
            w1=0.05 * jax.random.normal(ks[3], (dim, fc_dim), jnp.float32),
            fb1=0.05 * jax.random.normal(ks[4], (1, fc_dim), jnp.float32),
            w2=0.05 * jax.random.normal(ks[5], (fc_dim, dim), jnp.float32),
            fb2=0.05 * jax.random.normal(ks[6], (1, dim), jnp.float32),
        ))
    return layers


# ---------------- pure-JAX reference (mirrors the PyTorch forward) ----------------
def ref_forward(x, params, heads):
    eps = 1e-5
    B, N, D = x.shape
    dh = D // heads
    scale = D ** (-0.5)
    for p in params:
        mu = jnp.mean(x, -1, keepdims=True)
        var = jnp.mean((x - mu) ** 2, -1, keepdims=True)
        xn = (x - mu) / jnp.sqrt(var + eps) * p["g1"][0] + p["b1"][0]
        qkv = xn @ p["wqkv"]
        q, k, v = jnp.split(qkv, 3, axis=-1)
        q = q.reshape(B, N, heads, dh).transpose(0, 2, 1, 3)
        k = k.reshape(B, N, heads, dh).transpose(0, 2, 1, 3)
        v = v.reshape(B, N, heads, dh).transpose(0, 2, 1, 3)
        dots = jnp.einsum("bhid,bhjd->bhij", q, k) * scale
        attn = jax.nn.softmax(dots, axis=-1)
        out = jnp.einsum("bhij,bhjd->bhid", attn, v)
        out = out.transpose(0, 2, 1, 3).reshape(B, N, D)
        out = out @ p["wo"] + p["bo"][0]
        x = x + out

        mu2 = jnp.mean(x, -1, keepdims=True)
        var2 = jnp.mean((x - mu2) ** 2, -1, keepdims=True)
        xn2 = (x - mu2) / jnp.sqrt(var2 + eps) * p["g2"][0] + p["b2"][0]
        h1 = jnp.maximum(xn2 @ p["w1"] + p["fb1"][0], 0.0)
        x = x + (h1 @ p["w2"] + p["fb2"][0])
    return x


if __name__ == "__main__":
    B, N, DIM = 2, 8, 32
    DEPTH, HEADS, FC_DIM = 2, 4, 64

    key = jax.random.PRNGKey(0)
    kx, kp = jax.random.split(key)
    x = jax.random.normal(kx, (B, N, DIM), jnp.float32)
    params = init_params(kp, DEPTH, DIM, HEADS, FC_DIM)

    ref = ref_forward(x, params, HEADS)

    # 1) exact-math config (f32 matmul operands, exact reciprocal): tight check of logic.
    out_exact = transformer_forward(x, params, HEADS,
                                    matmul_dtype=jnp.float32, approx_recip=False)
    out_exact = jax.block_until_ready(out_exact)
    assert out_exact.shape == (B, N, DIM)
    assert jnp.max(jnp.abs(out_exact - ref)) < 1e-4, "Pallas output mismatch (f32 path)"

    # 2) performance config (bf16 MXU operands + EUP approx reciprocal): loose check.
    out_perf = transformer_forward(x, params, HEADS)   # defaults: bf16 + approx recip
    out_perf = jax.block_until_ready(out_perf)
    assert out_perf.shape == (B, N, DIM)
    assert jnp.max(jnp.abs(out_perf - ref)) < 3e-2, "Pallas output mismatch (bf16 path)"

    print("KERNEL_OK")
</pallas_src>

<mosaic_0001>
module attributes {stable_mosaic.version = 11 : i64} {
  func.func @_transformer_layer_kernel(%arg0: i32, %arg1: memref<16x32xf32, #tpu.memory_space<vmem>>, %arg2: memref<1x32xf32, #tpu.memory_space<vmem>>, %arg3: memref<1x32xf32, #tpu.memory_space<vmem>>, %arg4: memref<32x96xf32, #tpu.memory_space<vmem>>, %arg5: memref<32x32xf32, #tpu.memory_space<vmem>>, %arg6: memref<1x32xf32, #tpu.memory_space<vmem>>, %arg7: memref<1x32xf32, #tpu.memory_space<vmem>>, %arg8: memref<1x32xf32, #tpu.memory_space<vmem>>, %arg9: memref<32x64xf32, #tpu.memory_space<vmem>>, %arg10: memref<1x64xf32, #tpu.memory_space<vmem>>, %arg11: memref<64x32xf32, #tpu.memory_space<vmem>>, %arg12: memref<1x32xf32, #tpu.memory_space<vmem>>, %arg13: memref<16x32xf32, #tpu.memory_space<vmem>>, %arg14: memref<16x32xf32, #tpu.memory_space<vmem>>) attributes {dimension_semantics = [#tpu.dimension_semantics<parallel>], iteration_bounds = array<i64: 1>, scalar_prefetch = 0 : i64, scratch_operands = 1 : i64, tpu.core_type = #tpu.core_type<tc>, window_params = [{transform_indices = @transform_0, window_bounds = array<i64: 16, 32>}, {pipeline_mode = #tpu.pipeline_mode<synchronous>, transform_indices = @transform_1, window_bounds = array<i64: 1, 32>}, {pipeline_mode = #tpu.pipeline_mode<synchronous>, transform_indices = @transform_2, window_bounds = array<i64: 1, 32>}, {pipeline_mode = #tpu.pipeline_mode<synchronous>, transform_indices = @transform_3, window_bounds = array<i64: 32, 96>}, {pipeline_mode = #tpu.pipeline_mode<synchronous>, transform_indices = @transform_4, window_bounds = array<i64: 32, 32>}, {pipeline_mode = #tpu.pipeline_mode<synchronous>, transform_indices = @transform_5, window_bounds = array<i64: 1, 32>}, {pipeline_mode = #tpu.pipeline_mode<synchronous>, transform_indices = @transform_6, window_bounds = array<i64: 1, 32>}, {pipeline_mode = #tpu.pipeline_mode<synchronous>, transform_indices = @transform_7, window_bounds = array<i64: 1, 32>}, {pipeline_mode = #tpu.pipeline_mode<synchronous>, transform_indices = @transform_8, window_bounds = array<i64: 32, 64>}, {pipeline_mode = #tpu.pipeline_mode<synchronous>, transform_indices = @transform_9, window_bounds = array<i64: 1, 64>}, {pipeline_mode = #tpu.pipeline_mode<synchronous>, transform_indices = @transform_10, window_bounds = array<i64: 64, 32>}, {pipeline_mode = #tpu.pipeline_mode<synchronous>, transform_indices = @transform_11, window_bounds = array<i64: 1, 32>}, {transform_indices = @transform_12, window_bounds = array<i64: 16, 32>}]} {
    %c0 = arith.constant 0 : index
    %c0_0 = arith.constant 0 : index
    %0 = vector.load %arg1[%c0, %c0_0] : memref<16x32xf32, #tpu.memory_space<vmem>>, vector<16x32xf32>
    %cst = arith.constant dense<0.000000e+00> : vector<16xf32>
    %1 = vector.multi_reduction <add>, %0, %cst [1] : vector<16x32xf32> to vector<16xf32>
    %2 = vector.shape_cast %1 : vector<16xf32> to vector<16x1xf32>
    %cst_1 = arith.constant 3.200000e+01 : f32
    %3 = vector.broadcast %cst_1 : f32 to vector<16x1xf32>
    %4 = arith.divf %2, %3 : vector<16x1xf32>
    %5 = vector.broadcast %4 : vector<16x1xf32> to vector<16x32xf32>
    %6 = arith.subf %0, %5 : vector<16x32xf32>
    %7 = arith.mulf %6, %6 : vector<16x32xf32>
    %cst_2 = arith.constant dense<0.000000e+00> : vector<16xf32>
    %8 = vector.multi_reduction <add>, %7, %cst_2 [1] : vector<16x32xf32> to vector<16xf32>
    %9 = vector.shape_cast %8 : vector<16xf32> to vector<16x1xf32>
    %cst_3 = arith.constant 3.200000e+01 : f32
    %10 = vector.broadcast %cst_3 : f32 to vector<16x1xf32>
    %11 = arith.divf %9, %10 : vector<16x1xf32>
    %12 = vector.broadcast %4 : vector<16x1xf32> to vector<16x32xf32>
    %13 = arith.subf %0, %12 : vector<16x32xf32>
    %cst_4 = arith.constant 9.99999974E-6 : f32
    %14 = vector.broadcast %cst_4 : f32 to vector<16x1xf32>
    %15 = arith.addf %11, %14 : vector<16x1xf32>
    %16 = math.rsqrt %15 : vector<16x1xf32>
    %17 = vector.broadcast %16 : vector<16x1xf32> to vector<16x32xf32>
    %18 = arith.mulf %13, %17 : vector<16x32xf32>
    %c0_5 = arith.constant 0 : index
    %c0_6 = arith.constant 0 : index
    %19 = vector.load %arg2[%c0_5, %c0_6] : memref<1x32xf32, #tpu.memory_space<vmem>>, vector<1x32xf32>
    %20 = vector.broadcast %19 : vector<1x32xf32> to vector<16x32xf32>
    %21 = arith.mulf %18, %20 : vector<16x32xf32>
    %c0_7 = arith.constant 0 : index
    %c0_8 = arith.constant 0 : index
    %22 = vector.load %arg3[%c0_7, %c0_8] : memref<1x32xf32, #tpu.memory_space<vmem>>, vector<1x32xf32>
    %23 = vector.broadcast %22 : vector<1x32xf32> to vector<16x32xf32>
    %24 = arith.addf %21, %23 : vector<16x32xf32>
    %c0_9 = arith.constant 0 : index
    %c0_10 = arith.constant 0 : index
    %25 = vector.load %arg4[%c0_9, %c0_10] : memref<32x96xf32, #tpu.memory_space<vmem>>, vector<32x96xf32>
    %cst_11 = arith.constant dense<0.000000e+00> : vector<16x96xf32>
    %26 = tpu.matmul %24, %25, %cst_11 {dimension_numbers = #tpu.dot_dimension_numbers<[1], [0], [0], [1], [0, 0, 1, 1], [], []>} : vector<16x32xf32>, vector<32x96xf32>, vector<16x96xf32> -> vector<16x96xf32>
    %27 = vector.extract_strided_slice %26 {offsets = [0, 0], sizes = [16, 32], strides = [1, 1]} : vector<16x96xf32> to vector<16x32xf32>
    %cst_12 = arith.constant 0.176776692 : f32
    %28 = vector.broadcast %cst_12 : f32 to vector<16x32xf32>
    %29 = arith.mulf %27, %28 : vector<16x32xf32>
    %30 = vector.extract_strided_slice %26 {offsets = [0, 32], sizes = [16, 32], strides = [1, 1]} : vector<16x96xf32> to vector<16x32xf32>
    %31 = vector.extract_strided_slice %26 {offsets = [0, 64], sizes = [16, 32], strides = [1, 1]} : vector<16x96xf32> to vector<16x32xf32>
    %32 = vector.extract_strided_slice %29 {offsets = [0, 0], sizes = [16, 8], strides = [1, 1]} : vector<16x32xf32> to vector<16x8xf32>
    %33 = vector.shape_cast %32 : vector<16x8xf32> to vector<2x8x8xf32>
    %34 = vector.extract_strided_slice %30 {offsets = [0, 0], sizes = [16, 8], strides = [1, 1]} : vector<16x32xf32> to vector<16x8xf32>
    %35 = vector.shape_cast %34 : vector<16x8xf32> to vector<2x8x8xf32>
    %36 = vector.extract_strided_slice %31 {offsets = [0, 0], sizes = [16, 8], strides = [1, 1]} : vector<16x32xf32> to vector<16x8xf32>
    %37 = vector.shape_cast %36 : vector<16x8xf32> to vector<2x8x8xf32>
    "tpu.trace_start"() <{level = 10 : i32, message = "bqd,bkd->bqk"}> : () -> ()
    %cst_13 = arith.constant dense<0.000000e+00> : vector<2x8x8xf32>
    %38 = tpu.matmul %33, %35, %cst_13 {dimension_numbers = #tpu.dot_dimension_numbers<[2], [2], [1], [1], [0, 0, 0, 1, 1, 1], [0], [0]>} : vector<2x8x8xf32>, vector<2x8x8xf32>, vector<2x8x8xf32> -> vector<2x8x8xf32>
    "tpu.trace_stop"() : () -> ()
    %cst_14 = arith.constant dense<0xFF800000> : vector<2x8xf32>
    %39 = vector.multi_reduction <maximumf>, %38, %cst_14 [2] : vector<2x8x8xf32> to vector<2x8xf32>
    %40 = vector.shape_cast %39 : vector<2x8xf32> to vector<2x8x1xf32>
    %41 = vector.broadcast %40 : vector<2x8x1xf32> to vector<2x8x8xf32>
    %42 = arith.subf %38, %41 : vector<2x8x8xf32>
    %43 = math.exp %42 : vector<2x8x8xf32>
    %cst_15 = arith.constant dense<0.000000e+00> : vector<2x8xf32>
    %44 = vector.multi_reduction <add>, %43, %cst_15 [2] : vector<2x8x8xf32> to vector<2x8xf32>
    %45 = vector.shape_cast %44 : vector<2x8xf32> to vector<2x8x1xf32>
    %46 = tpu.reciprocal %45 : vector<2x8x1xf32> -> vector<2x8x1xf32>
    %47 = vector.broadcast %46 : vector<2x8x1xf32> to vector<2x8x8xf32>
    %48 = arith.mulf %43, %47 : vector<2x8x8xf32>
    "tpu.trace_start"() <{level = 10 : i32, message = "bqk,bkd->bqd"}> : () -> ()
    %cst_16 = arith.constant dense<0.000000e+00> : vector<2x8x8xf32>
    %49 = tpu.matmul %48, %37, %cst_16 {dimension_numbers = #tpu.dot_dimension_numbers<[2], [1], [1], [2], [0, 0, 0, 1, 1, 2], [0], [0]>} : vector<2x8x8xf32>, vector<2x8x8xf32>, vector<2x8x8xf32> -> vector<2x8x8xf32>
    "tpu.trace_stop"() : () -> ()
    %50 = vector.shape_cast %49 : vector<2x8x8xf32> to vector<16x8xf32>
    %c0_17 = arith.constant 0 : index
    %c0_18 = arith.constant 0 : index
    %51 = vector.load %arg14[%c0_17, %c0_18] : memref<16x32xf32, #tpu.memory_space<vmem>>, vector<16x8xf32>
    tpu.vector_store %arg14[%c0_17, %c0_18], %50 {strides = array<i32>} : memref<16x32xf32, #tpu.memory_space<vmem>>, vector<16x8xf32>,
    %52 = vector.extract_strided_slice %29 {offsets = [0, 8], sizes = [16, 8], strides = [1, 1]} : vector<16x32xf32> to vector<16x8xf32>
    %53 = vector.shape_cast %52 : vector<16x8xf32> to vector<2x8x8xf32>
    %54 = vector.extract_strided_slice %30 {offsets = [0, 8], sizes = [16, 8], strides = [1, 1]} : vector<16x32xf32> to vector<16x8xf32>
    %55 = vector.shape_cast %54 : vector<16x8xf32> to vector<2x8x8xf32>
    %56 = vector.extract_strided_slice %31 {offsets = [0, 8], sizes = [16, 8], strides = [1, 1]} : vector<16x32xf32> to vector<16x8xf32>
    %57 = vector.shape_cast %56 : vector<16x8xf32> to vector<2x8x8xf32>
    "tpu.trace_start"() <{level = 10 : i32, message = "bqd,bkd->bqk"}> : () -> ()
    %cst_19 = arith.constant dense<0.000000e+00> : vector<2x8x8xf32>
    %58 = tpu.matmul %53, %55, %cst_19 {dimension_numbers = #tpu.dot_dimension_numbers<[2], [2], [1], [1], [0, 0, 0, 1, 1, 1], [0], [0]>} : vector<2x8x8xf32>, vector<2x8x8xf32>, vector<2x8x8xf32> -> vector<2x8x8xf32>
    "tpu.trace_stop"() : () -> ()
    %cst_20 = arith.constant dense<0xFF800000> : vector<2x8xf32>
    %59 = vector.multi_reduction <maximumf>, %58, %cst_20 [2] : vector<2x8x8xf32> to vector<2x8xf32>
    %60 = vector.shape_cast %59 : vector<2x8xf32> to vector<2x8x1xf32>
    %61 = vector.broadcast %60 : vector<2x8x1xf32> to vector<2x8x8xf32>
    %62 = arith.subf %58, %61 : vector<2x8x8xf32>
    %63 = math.exp %62 : vector<2x8x8xf32>
    %cst_21 = arith.constant dense<0.000000e+00> : vector<2x8xf32>
    %64 = vector.multi_reduction <add>, %63, %cst_21 [2] : vector<2x8x8xf32> to vector<2x8xf32>
    %65 = vector.shape_cast %64 : vector<2x8xf32> to vector<2x8x1xf32>
    %66 = tpu.reciprocal %65 : vector<2x8x1xf32> -> vector<2x8x1xf32>
    %67 = vector.broadcast %66 : vector<2x8x1xf32> to vector<2x8x8xf32>
    %68 = arith.mulf %63, %67 : vector<2x8x8xf32>
    "tpu.trace_start"() <{level = 10 : i32, message = "bqk,bkd->bqd"}> : () -> ()
    %cst_22 = arith.constant dense<0.000000e+00> : vector<2x8x8xf32>
    %69 = tpu.matmul %68, %57, %cst_22 {dimension_numbers = #tpu.dot_dimension_numbers<[2], [1], [1], [2], [0, 0, 0, 1, 1, 2], [0], [0]>} : vector<2x8x8xf32>, vector<2x8x8xf32>, vector<2x8x8xf32> -> vector<2x8x8xf32>
    "tpu.trace_stop"() : () -> ()
    %70 = vector.shape_cast %69 : vector<2x8x8xf32> to vector<16x8xf32>
    %c0_23 = arith.constant 0 : index
    %c8 = arith.constant 8 : index
    %71 = vector.load %arg14[%c0_23, %c8] : memref<16x32xf32, #tpu.memory_space<vmem>>, vector<16x8xf32>
    tpu.vector_store %arg14[%c0_23, %c8], %70 {strides = array<i32>} : memref<16x32xf32, #tpu.memory_space<vmem>>, vector<16x8xf32>,
    %72 = vector.extract_strided_slice %29 {offsets = [0, 16], sizes = [16, 8], strides = [1, 1]} : vector<16x32xf32> to vector<16x8xf32>
    %73 = vector.shape_cast %72 : vector<16x8xf32> to vector<2x8x8xf32>
    %74 = vector.extract_strided_slice %30 {offsets = [0, 16], sizes = [16, 8], strides = [1, 1]} : vector<16x32xf32> to vector<16x8xf32>
    %75 = vector.shape_cast %74 : vector<16x8xf32> to vector<2x8x8xf32>
    %76 = vector.extract_strided_slice %31 {offsets = [0, 16], sizes = [16, 8], strides = [1, 1]} : vector<16x32xf32> to vector<16x8xf32>
    %77 = vector.shape_cast %76 : vector<16x8xf32> to vector<2x8x8xf32>
    "tpu.trace_start"() <{level = 10 : i32, message = "bqd,bkd->bqk"}> : () -> ()
    %cst_24 = arith.constant dense<0.000000e+00> : vector<2x8x8xf32>
    %78 = tpu.matmul %73, %75, %cst_24 {dimension_numbers = #tpu.dot_dimension_numbers<[2], [2], [1], [1], [0, 0, 0, 1, 1, 1], [0], [0]>} : vector<2x8x8xf32>, vector<2x8x8xf32>, vector<2x8x8xf32> -> vector<2x8x8xf32>
    "tpu.trace_stop"() : () -> ()
    %cst_25 = arith.constant dense<0xFF800000> : vector<2x8xf32>
    %79 = vector.multi_reduction <maximumf>, %78, %cst_25 [2] : vector<2x8x8xf32> to vector<2x8xf32>
    %80 = vector.shape_cast %79 : vector<2x8xf32> to vector<2x8x1xf32>
    %81 = vector.broadcast %80 : vector<2x8x1xf32> to vector<2x8x8xf32>
    %82 = arith.subf %78, %81 : vector<2x8x8xf32>
    %83 = math.exp %82 : vector<2x8x8xf32>
    %cst_26 = arith.constant dense<0.000000e+00> : vector<2x8xf32>
    %84 = vector.multi_reduction <add>, %83, %cst_26 [2] : vector<2x8x8xf32> to vector<2x8xf32>
    %85 = vector.shape_cast %84 : vector<2x8xf32> to vector<2x8x1xf32>
    %86 = tpu.reciprocal %85 : vector<2x8x1xf32> -> vector<2x8x1xf32>
    %87 = vector.broadcast %86 : vector<2x8x1xf32> to vector<2x8x8xf32>
    %88 = arith.mulf %83, %87 : vector<2x8x8xf32>
    "tpu.trace_start"() <{level = 10 : i32, message = "bqk,bkd->bqd"}> : () -> ()
    %cst_27 = arith.constant dense<0.000000e+00> : vector<2x8x8xf32>
    %89 = tpu.matmul %88, %77, %cst_27 {dimension_numbers = #tpu.dot_dimension_numbers<[2], [1], [1], [2], [0, 0, 0, 1, 1, 2], [0], [0]>} : vector<2x8x8xf32>, vector<2x8x8xf32>, vector<2x8x8xf32> -> vector<2x8x8xf32>
    "tpu.trace_stop"() : () -> ()
    %90 = vector.shape_cast %89 : vector<2x8x8xf32> to vector<16x8xf32>
    %c0_28 = arith.constant 0 : index
    %c16 = arith.constant 16 : index
    %91 = vector.load %arg14[%c0_28, %c16] : memref<16x32xf32, #tpu.memory_space<vmem>>, vector<16x8xf32>
    tpu.vector_store %arg14[%c0_28, %c16], %90 {strides = array<i32>} : memref<16x32xf32, #tpu.memory_space<vmem>>, vector<16x8xf32>,
    %92 = vector.extract_strided_slice %29 {offsets = [0, 24], sizes = [16, 8], strides = [1, 1]} : vector<16x32xf32> to vector<16x8xf32>
    %93 = vector.shape_cast %92 : vector<16x8xf32> to vector<2x8x8xf32>
    %94 = vector.extract_strided_slice %30 {offsets = [0, 24], sizes = [16, 8], strides = [1, 1]} : vector<16x32xf32> to vector<16x8xf32>
    %95 = vector.shape_cast %94 : vector<16x8xf32> to vector<2x8x8xf32>
    %96 = vector.extract_strided_slice %31 {offsets = [0, 24], sizes = [16, 8], strides = [1, 1]} : vector<16x32xf32> to vector<16x8xf32>
    %97 = vector.shape_cast %96 : vector<16x8xf32> to vector<2x8x8xf32>
    "tpu.trace_start"() <{level = 10 : i32, message = "bqd,bkd->bqk"}> : () -> ()
    %cst_29 = arith.constant dense<0.000000e+00> : vector<2x8x8xf32>
    %98 = tpu.matmul %93, %95, %cst_29 {dimension_numbers = #tpu.dot_dimension_numbers<[2], [2], [1], [1], [0, 0, 0, 1, 1, 1], [0], [0]>} : vector<2x8x8xf32>, vector<2x8x8xf32>, vector<2x8x8xf32> -> vector<2x8x8xf32>
    "tpu.trace_stop"() : () -> ()
    %cst_30 = arith.constant dense<0xFF800000> : vector<2x8xf32>
    %99 = vector.multi_reduction <maximumf>, %98, %cst_30 [2] : vector<2x8x8xf32> to vector<2x8xf32>
    %100 = vector.shape_cast %99 : vector<2x8xf32> to vector<2x8x1xf32>
    %101 = vector.broadcast %100 : vector<2x8x1xf32> to vector<2x8x8xf32>
    %102 = arith.subf %98, %101 : vector<2x8x8xf32>
    %103 = math.exp %102 : vector<2x8x8xf32>
    %cst_31 = arith.constant dense<0.000000e+00> : vector<2x8xf32>
    %104 = vector.multi_reduction <add>, %103, %cst_31 [2] : vector<2x8x8xf32> to vector<2x8xf32>
    %105 = vector.shape_cast %104 : vector<2x8xf32> to vector<2x8x1xf32>
    %106 = tpu.reciprocal %105 : vector<2x8x1xf32> -> vector<2x8x1xf32>
    %107 = vector.broadcast %106 : vector<2x8x1xf32> to vector<2x8x8xf32>
    %108 = arith.mulf %103, %107 : vector<2x8x8xf32>
    "tpu.trace_start"() <{level = 10 : i32, message = "bqk,bkd->bqd"}> : () -> ()
    %cst_32 = arith.constant dense<0.000000e+00> : vector<2x8x8xf32>
    %109 = tpu.matmul %108, %97, %cst_32 {dimension_numbers = #tpu.dot_dimension_numbers<[2], [1], [1], [2], [0, 0, 0, 1, 1, 2], [0], [0]>} : vector<2x8x8xf32>, vector<2x8x8xf32>, vector<2x8x8xf32> -> vector<2x8x8xf32>
    "tpu.trace_stop"() : () -> ()
    %110 = vector.shape_cast %109 : vector<2x8x8xf32> to vector<16x8xf32>
    %c0_33 = arith.constant 0 : index
    %c24 = arith.constant 24 : index
    %111 = vector.load %arg14[%c0_33, %c24] : memref<16x32xf32, #tpu.memory_space<vmem>>, vector<16x8xf32>
    tpu.vector_store %arg14[%c0_33, %c24], %110 {strides = array<i32>} : memref<16x32xf32, #tpu.memory_space<vmem>>, vector<16x8xf32>,
    %c0_34 = arith.constant 0 : index
    %c0_35 = arith.constant 0 : index
    %112 = vector.load %arg14[%c0_34, %c0_35] : memref<16x32xf32, #tpu.memory_space<vmem>>, vector<16x32xf32>
    %c0_36 = arith.constant 0 : index
    %c0_37 = arith.constant 0 : index
    %113 = vector.load %arg5[%c0_36, %c0_37] : memref<32x32xf32, #tpu.memory_space<vmem>>, vector<32x32xf32>
    %cst_38 = arith.constant dense<0.000000e+00> : vector<16x32xf32>
    %114 = tpu.matmul %112, %113, %cst_38 {dimension_numbers = #tpu.dot_dimension_numbers<[1], [0], [0], [1], [0, 0, 1, 1], [], []>} : vector<16x32xf32>, vector<32x32xf32>, vector<16x32xf32> -> vector<16x32xf32>
    %c0_39 = arith.constant 0 : index
    %c0_40 = arith.constant 0 : index
    %115 = vector.load %arg6[%c0_39, %c0_40] : memref<1x32xf32, #tpu.memory_space<vmem>>, vector<1x32xf32>
    %116 = vector.broadcast %115 : vector<1x32xf32> to vector<16x32xf32>
    %117 = arith.addf %114, %116 : vector<16x32xf32>
    %118 = arith.addf %0, %117 : vector<16x32xf32>
    %cst_41 = arith.constant dense<0.000000e+00> : vector<16xf32>
    %119 = vector.multi_reduction <add>, %118, %cst_41 [1] : vector<16x32xf32> to vector<16xf32>
    %120 = vector.shape_cast %119 : vector<16xf32> to vector<16x1xf32>
    %cst_42 = arith.constant 3.200000e+01 : f32
    %121 = vector.broadcast %cst_42 : f32 to vector<16x1xf32>
    %122 = arith.divf %120, %121 : vector<16x1xf32>
    %123 = vector.broadcast %122 : vector<16x1xf32> to vector<16x32xf32>
    %124 = arith.subf %118, %123 : vector<16x32xf32>
    %125 = arith.mulf %124, %124 : vector<16x32xf32>
    %cst_43 = arith.constant dense<0.000000e+00> : vector<16xf32>
    %126 = vector.multi_reduction <add>, %125, %cst_43 [1] : vector<16x32xf32> to vector<16xf32>
    %127 = vector.shape_cast %126 : vector<16xf32> to vector<16x1xf32>
    %cst_44 = arith.constant 3.200000e+01 : f32
    %128 = vector.broadcast %cst_44 : f32 to vector<16x1xf32>
    %129 = arith.divf %127, %128 : vector<16x1xf32>
    %130 = vector.broadcast %122 : vector<16x1xf32> to vector<16x32xf32>
    %131 = arith.subf %118, %130 : vector<16x32xf32>
    %cst_45 = arith.constant 9.99999974E-6 : f32
    %132 = vector.broadcast %cst_45 : f32 to vector<16x1xf32>
    %133 = arith.addf %129, %132 : vector<16x1xf32>
    %134 = math.rsqrt %133 : vector<16x1xf32>
    %135 = vector.broadcast %134 : vector<16x1xf32> to vector<16x32xf32>
    %136 = arith.mulf %131, %135 : vector<16x32xf32>
    %c0_46 = arith.constant 0 : index
    %c0_47 = arith.constant 0 : index
    %137 = vector.load %arg7[%c0_46, %c0_47] : memref<1x32xf32, #tpu.memory_space<vmem>>, vector<1x32xf32>
    %138 = vector.broadcast %137 : vector<1x32xf32> to vector<16x32xf32>
    %139 = arith.mulf %136, %138 : vector<16x32xf32>
    %c0_48 = arith.constant 0 : index
    %c0_49 = arith.constant 0 : index
    %140 = vector.load %arg8[%c0_48, %c0_49] : memref<1x32xf32, #tpu.memory_space<vmem>>, vector<1x32xf32>
    %141 = vector.broadcast %140 : vector<1x32xf32> to vector<16x32xf32>
    %142 = arith.addf %139, %141 : vector<16x32xf32>
    %c0_50 = arith.constant 0 : index
    %c0_51 = arith.constant 0 : index
    %143 = vector.load %arg9[%c0_50, %c0_51] : memref<32x64xf32, #tpu.memory_space<vmem>>, vector<32x64xf32>
    %cst_52 = arith.constant dense<0.000000e+00> : vector<16x64xf32>
    %144 = tpu.matmul %142, %143, %cst_52 {dimension_numbers = #tpu.dot_dimension_numbers<[1], [0], [0], [1], [0, 0, 1, 1], [], []>} : vector<16x32xf32>, vector<32x64xf32>, vector<16x64xf32> -> vector<16x64xf32>
    %c0_53 = arith.constant 0 : index
    %c0_54 = arith.constant 0 : index
    %145 = vector.load %arg10[%c0_53, %c0_54] : memref<1x64xf32, #tpu.memory_space<vmem>>, vector<1x64xf32>
    %146 = vector.broadcast %145 : vector<1x64xf32> to vector<16x64xf32>
    %147 = arith.addf %144, %146 : vector<16x64xf32>
    %cst_55 = arith.constant 0.000000e+00 : f32
    %148 = vector.broadcast %cst_55 : f32 to vector<16x64xf32>
    %149 = arith.maximumf %147, %148 : vector<16x64xf32>
    %c0_56 = arith.constant 0 : index
    %c0_57 = arith.constant 0 : index
    %150 = vector.load %arg11[%c0_56, %c0_57] : memref<64x32xf32, #tpu.memory_space<vmem>>, vector<64x32xf32>
    %cst_58 = arith.constant dense<0.000000e+00> : vector<16x32xf32>
    %151 = tpu.matmul %149, %150, %cst_58 {dimension_numbers = #tpu.dot_dimension_numbers<[1], [0], [0], [1], [0, 0, 1, 1], [], []>} : vector<16x64xf32>, vector<64x32xf32>, vector<16x32xf32> -> vector<16x32xf32>
    %c0_59 = arith.constant 0 : index
    %c0_60 = arith.constant 0 : index
    %152 = vector.load %arg12[%c0_59, %c0_60] : memref<1x32xf32, #tpu.memory_space<vmem>>, vector<1x32xf32>
    %153 = vector.broadcast %152 : vector<1x32xf32> to vector<16x32xf32>
    %154 = arith.addf %151, %153 : vector<16x32xf32>
    %155 = arith.addf %118, %154 : vector<16x32xf32>
    %c0_61 = arith.constant 0 : index
    %c0_62 = arith.constant 0 : index
    %156 = vector.load %arg13[%c0_61, %c0_62] : memref<16x32xf32, #tpu.memory_space<vmem>>, vector<16x32xf32>
    tpu.vector_store %arg13[%c0_61, %c0_62], %155 {strides = array<i32>} : memref<16x32xf32, #tpu.memory_space<vmem>>, vector<16x32xf32>,
    return
  }
  func.func @transform_0(%arg0: i32) -> (i32, i32) {
    %c0_i32 = arith.constant 0 : i32
    %c0_i32_0 = arith.constant 0 : i32
    return %arg0, %c0_i32 : i32, i32
  }
  func.func @transform_1(%arg0: i32) -> (i32, i32) {
    %c0_i32 = arith.constant 0 : i32
    %c0_i32_0 = arith.constant 0 : i32
    %c0_i32_1 = arith.constant 0 : i32
    return %c0_i32, %c0_i32_0 : i32, i32
  }
  func.func @transform_2(%arg0: i32) -> (i32, i32) {
    %c0_i32 = arith.constant 0 : i32
    %c0_i32_0 = arith.constant 0 : i32
    %c0_i32_1 = arith.constant 0 : i32
    return %c0_i32, %c0_i32_0 : i32, i32
  }
  func.func @transform_3(%arg0: i32) -> (i32, i32) {
    %c0_i32 = arith.constant 0 : i32
    %c0_i32_0 = arith.constant 0 : i32
    %c0_i32_1 = arith.constant 0 : i32
    return %c0_i32, %c0_i32_0 : i32, i32
  }
  func.func @transform_4(%arg0: i32) -> (i32, i32) {
    %c0_i32 = arith.constant 0 : i32
    %c0_i32_0 = arith.constant 0 : i32
    %c0_i32_1 = arith.constant 0 : i32
    return %c0_i32, %c0_i32_0 : i32, i32
  }
  func.func @transform_5(%arg0: i32) -> (i32, i32) {
    %c0_i32 = arith.constant 0 : i32
    %c0_i32_0 = arith.constant 0 : i32
    %c0_i32_1 = arith.constant 0 : i32
    return %c0_i32, %c0_i32_0 : i32, i32
  }
  func.func @transform_6(%arg0: i32) -> (i32, i32) {
    %c0_i32 = arith.constant 0 : i32
    %c0_i32_0 = arith.constant 0 : i32
    %c0_i32_1 = arith.constant 0 : i32
    return %c0_i32, %c0_i32_0 : i32, i32
  }
  func.func @transform_7(%arg0: i32) -> (i32, i32) {
    %c0_i32 = arith.constant 0 : i32
    %c0_i32_0 = arith.constant 0 : i32
    %c0_i32_1 = arith.constant 0 : i32
    return %c0_i32, %c0_i32_0 : i32, i32
  }
  func.func @transform_8(%arg0: i32) -> (i32, i32) {
    %c0_i32 = arith.constant 0 : i32
    %c0_i32_0 = arith.constant 0 : i32
    %c0_i32_1 = arith.constant 0 : i32
    return %c0_i32, %c0_i32_0 : i32, i32
  }
  func.func @transform_9(%arg0: i32) -> (i32, i32) {
    %c0_i32 = arith.constant 0 : i32
    %c0_i32_0 = arith.constant 0 : i32
    %c0_i32_1 = arith.constant 0 : i32
    return %c0_i32, %c0_i32_0 : i32, i32
  }
  func.func @transform_10(%arg0: i32) -> (i32, i32) {
    %c0_i32 = arith.constant 0 : i32
    %c0_i32_0 = arith.constant 0 : i32
    %c0_i32_1 = arith.constant 0 : i32
    return %c0_i32, %c0_i32_0 : i32, i32
  }
  func.func @transform_11(%arg0: i32) -> (i32, i32) {
    %c0_i32 = arith.constant 0 : i32
    %c0_i32_0 = arith.constant 0 : i32
    %c0_i32_1 = arith.constant 0 : i32
    return %c0_i32, %c0_i32_0 : i32, i32
  }
  func.func @transform_12(%arg0: i32) -> (i32, i32) {
    %c0_i32 = arith.constant 0 : i32
    %c0_i32_0 = arith.constant 0 : i32
    return %arg0, %c0_i32 : i32, i32
  }
}

</mosaic_0001>

<bundles_post_ra>
// kernel: tpu_custom_call.1
= control target key start
LH: loop header
LB: loop body
LE: loop exit
PB: predicated region body
PF: predicated region fallthrough
CT: control target
= control target key end

     0   :  { %17 = vsyncpa [#allocation4], 0  ;;  %s2690_s0 = inlined_call_operand.hbm [shape: f32[16,32], index: 0, kind: input, shape index: {}]   ;;  %s2691_s1 = inlined_call_operand.vmem [shape: f32[1,32], index: 1, kind: input, shape index: {}]   ;;  %s2692_s2 = inlined_call_operand.vmem [shape: f32[1,32], index: 2, kind: input, shape index: {}]   ;;  %s2693_s3 = inlined_call_operand.vmem [shape: f32[32,96], index: 3, kind: input, shape index: {}]   ;;  %s2694_s4 = inlined_call_operand.vmem [shape: f32[32,32], index: 4, kind: input, shape index: {}]   ;;  %s2695_s5 = inlined_call_operand.vmem [shape: f32[1,32], index: 5, kind: input, shape index: {}]   ;;  %s2696_s6 = inlined_call_operand.vmem [shape: f32[1,32], index: 6, kind: input, shape index: {}]   ;;  %s2697_s7 = inlined_call_operand.vmem [shape: f32[1,32], index: 7, kind: input, shape index: {}]   ;;  %s2698_s8 = inlined_call_operand.vmem [shape: f32[32,64], index: 8, kind: input, shape index: {}]   ;;  %s2699_s9 = inlined_call_operand.hbm [shape: f32[1,64], index: 9, kind: input, shape index: {}]   ;;  %s2700_s10 = inlined_call_operand.vmem [shape: f32[64,32], index: 10, kind: input, shape index: {}]   ;;  %s2701_s11 = inlined_call_operand.vmem [shape: f32[1,32], index: 11, kind: input, shape index: {}]   ;;  %s2702_s12 = inlined_call_operand.hbm [shape: f32[16,32], index: 12, kind: output, shape index: {}]  }
   0x1   :  { %18 = vsyncpa [#allocation7], 0 }
   0x2   :  { %19 = vsyncpa [#allocation5], 0  ;;  %s2315_s21 = smov [#allocation3]   ;;  %s2243_s25 = scalar_lea.hbm %s2690_s0, 256 }
   0x3   :  { %s25_s22 = sshll.u32 %s2315_s21, 4  ;;  %p2244_p0 = scmp.ne.s32.totalorder %s2690_s0, %s2243_s25  ;;  %s26_s22 = int_to_ptr.vmem [resolvable:$true] %s25_s22 }
   0x4   :  { %p2247_p1 = scmp.lt.u32.totalorder %s2243_s25, %s2690_s0 }
   0x6   :  { %p2249_p2 = pnand %p2247_p1, %p2244_p0 }
   0x8   :  { %2252 = shalt.err (!%p2249_p2)
}
   0x9   :  { %s2253_s30 = scalar_lea.vmem %s26_s22, 256  ;;  %p2258_p4 = scmp.lt.s32.totalorder %s26_s22, %s26_s22 }
   0xa   :  { %p2254_p3 = scmp.ne.s32.totalorder %s26_s22, %s2253_s30  ;;  %p2259_p5 = scmp.lt.s32.totalorder %s2253_s30, %s2253_s30 }
   0xc   :  { %p2260_p6 = por %p2259_p5, %p2258_p4 }
   0xe   :  { %p2261_p7 = pnand %p2260_p6, %p2254_p3 }
  0x10   :  { %2264 = shalt.err (!%p2261_p7)
}
  0x11   :  { %s2316_s13 = smov 128   ;;  %s2317_s14 = smov 8  }
  0x12   :  { %31 = dma.hbm_to_vmem [thread:$0]  %s2690_s0, 256, %s26_s22, [#allocation4], %s2316_s13, %s2316_s13, %s2317_s14  }
  0x13   :  { %s2318_s17 = smov [#allocation6]   ;;  %s2265_s21 = scalar_lea.hbm %s2699_s9, 16 }
  0x14   :  { %s54_s18 = sshll.u32 %s2318_s17, 4  ;;  %p2266_p8 = scmp.ne.s32.totalorder %s2699_s9, %s2265_s21  ;;  %s55_s18 = int_to_ptr.vmem [resolvable:$true] %s54_s18 }
  0x15   :  { %p2269_p9 = scmp.lt.u32.totalorder %s2265_s21, %s2699_s9 }
  0x17   :  { %p2271_p10 = pnand %p2269_p9, %p2266_p8 }
  0x19   :  { %2274 = shalt.err (!%p2271_p10)
}
  0x1a   :  { %s2275_s27 = scalar_lea.vmem %s55_s18, 16  ;;  %s2279_s0 = scalar_lea.vmem %s55_s18, 32 }
  0x1b   :  { %p2276_p11 = scmp.ne.s32.totalorder %s55_s18, %s2275_s27  ;;  %p2280_p12 = scmp.lt.s32.totalorder %s55_s18, %s55_s18 }
  0x1c   :  { %p2281_p13 = scmp.lt.s32.totalorder %s2279_s0, %s2275_s27 }
  0x1e   :  { %p2282_p0 = por %p2281_p13, %p2280_p12 }
  0x20   :  { %p2283_p1 = pnand %p2282_p0, %p2276_p11 }
  0x22   :  { %2286 = shalt.err (!%p2283_p1)
}
  0x23   :  { %57 = dma.hbm_to_vmem [thread:$0]  %s2699_s9, 16, %s55_s18, [#allocation7]  }
  0x24   :  { %2309 = dma.done.wait [#allocation4], 256  }
  0x25   :  { %2310 = vsyncadd [#allocation4], 4294967040 }
  0x26   :  { %2311 = dma.done.wait [#allocation7], 16  }
  0x27   :  { %2312 = vsyncadd [#allocation7], 4294967280  ;;  %vm70_vm0 = vcmask 261120   ;;  %v2427_v0 = vld [vmem:[#allocation3] sm:$0xff]  ;;  %v2429_v1 = vld [vmem:[#allocation3 + $0x8] sm:$0xff]  ;;  %v2319_v36 = vmov 0.0  }
  0x28   :  { %v71_v2 = vsel %vm70_vm0, %v2427_v0, 0.0  ;;  %v74_v3 = vsel %vm70_vm0, %v2429_v1, 0.0  ;;  %v116_v14 = vld [vmem:[%s2693_s3] sm:$0xff]  ;;  %v117_v15 = vld [vmem:[%s2693_s3 + $0x8] sm:$0xff]  ;;  %v118_v16 = vld [vmem:[%s2693_s3 + $0x10] sm:$0xff]  ;;  %2032 = vmatprep.subr.mxu0 %v2319_v36  ;;  %vm2320_vm1 = vmmov 0  }
  0x29   :  { %72 = vadd.xlane.f32.xlu0 %v71_v2  ;;  %v2143_v17 = vpack.c.bf16 %v117_v15, %v116_v14  ;;  %v119_v18 = vld [vmem:[%s2693_s3 + $0x18] sm:$0xff]  ;;  %v1912_v27 = vld [vmem:[%s2691_s1] ss:$0 sm:$0xff]  ;;  %2034 = vmatprep.mubr.msk.f32.mxu0 %vm2320_vm1, %v2319_v36  ;;  %s2321_s1 = smov 96   ;;  %vm206_vm2 = vcmask 64512   ;;  %s2323_s24 = smov 88  }
  0x2a   :  { %v2147_v19 = vpack.c.bf16 %v119_v18, %v118_v16  ;;  %v1913_v29 = vld [vmem:[%s2692_s2] ss:$0 sm:$0xff]  ;;  %s2322_s2 = smov 64   ;;  %s2324_s25 = smov 120   ;;  %vm874_vm3 = vcmask 130112   ;;  %vm1215_vm4 = vcmask 195712  }
  0x2b   :  { %2144 = vmatprep.subr.bf16.mxu1 %v2143_v17  ;;  %s2325_s26 = smov 56   ;;  %s2326_s27 = smov 80   ;;  %vm1556_vm5 = vcmask 261312   ;;  %vm1808_vm6 = vcmask 523264  }
  0x2c   :  { %2146 = vmatpush3.bf16.msra.mxu1 %v2143_v17  ;;  %s2327_s0 = smov 112   ;;  %s2328_s22 = smov 48  }
  0x2d   :  { %75 = vadd.xlane.f32.xlu0 %v74_v3  ;;  %2148 = vmatprep.subr.bf16.mxu1 %v2147_v19  ;;  %s2329_s28 = smov 72   ;;  %s2330_s9 = smov 104  }
  0x2e   :  { %s2331_s29 = smov 40   ;;  %s2332_s30 = smov 16  }
  0x2f   :  { %s2333_s23 = smov 24  }
  0x30   :  { %2150 = vmatpush3.bf16.msra.mxu1 %v2147_v19 }
  0x31   :  { %2022 = vmatprep.subr.mxu1 %v2319_v36 }
  0xb6   :  { %v73_v4 = vpop.xlane.xlu0 %72 }
  0xb7   :  { %v78_v5 = vmul.f32 0.03125, %v73_v4 }
  0xb9   :  { %v80_v6 = vsub.f32 %v2427_v0, %v78_v5 }
  0xba   :  { %v76_v7 = vpop.xlane.xlu0 %75 }
  0xbb   :  { %v79_v8 = vmul.f32 0.03125, %v76_v7  ;;  %v82_v9 = vmul.f32 %v80_v6, %v80_v6 }
  0xbd   :  { %v81_v10 = vsub.f32 %v2429_v1, %v79_v8  ;;  %v84_v11 = vsel %vm70_vm0, %v82_v9, 0.0 }
  0xbe   :  { %85 = vadd.xlane.f32.xlu1 %v84_v11 }
  0xbf   :  { %v83_v12 = vmul.f32 %v81_v10, %v81_v10 }
  0xc1   :  { %v87_v13 = vsel %vm70_vm0, %v83_v12, 0.0 }
  0xc2   :  { %88 = vadd.xlane.f32.xlu1 %v87_v13 }
 0x14b   :  { %v86_v20 = vpop.xlane.xlu1 %85 }
 0x14c   :  { %v90_v21 = vmul.f32 0.03125, %v86_v20 }
 0x14e   :  { %v92_v22 = vadd.f32 1e-05, %v90_v21 }
 0x14f   :  { %v89_v23 = vpop.xlane.xlu1 %88 }
 0x150   :  { %2203 = vrsqrt.f32 %v92_v22  ;;  %v91_v24 = vmul.f32 0.03125, %v89_v23 }
 0x152   :  { %v93_v25 = vadd.f32 1e-05, %v91_v24 }
 0x154   :  { %2205 = vrsqrt.f32 %v93_v25 }
 0x15a   :  { %v2204_v26 = vpop.eup %2203 }
 0x15b   :  { %v96_v28 = vmul.f32 %v2204_v26, %v80_v6 }
 0x15d   :  { %v105_v30 = vmul.f32 %v1912_v27, %v96_v28 }
 0x15e   :  { %v2206_v31 = vpop.eup %2205 }
 0x15f   :  { %v97_v32 = vmul.f32 %v2206_v31, %v81_v10  ;;  %v114_v33 = vadd.f32 %v1913_v29, %v105_v30 }
 0x161   :  { %v106_v34 = vmul.f32 %v1912_v27, %v97_v32  ;;  %2019 = vmatprep.mubr.msk.f32.mxu1 %vm70_vm0, %v114_v33 }
 0x163   :  { %v115_v35 = vadd.f32 %v1913_v29, %v106_v34 }
 0x165   :  { %2020 = vmatmul.mubr.msk.f32.vlgmr.msra.gmra.mrb[0].mxu1 %vm70_vm0, %v115_v35 }
 0x166   :  { %2024 = vmatprep.mubr.msk.f32.mxu1 %vm2320_vm1, %v2319_v36 }
 0x238   :  { %v2465_v37 = vpop.f32.mrb[0].mxu1 }
 0x239   :  { %283 = vrot.lane.b32.xlu1 %v2465_v37, %s2321_s1  ;;  %v2468_v38 = vpop.f32.mrb[1].mxu1  ;;  %v2482_v42 = vmul.f32 0.17677669, %v2465_v37 }
 0x23a   :  { %204 = vrot.lane.b32.xlu0 %v2468_v38, %s2321_s1  ;;  %v2473_v40 = vmul.f32 0.17677669, %v2468_v38 }
 0x2ab   :  { %v284_v41 = vpop.permute.xlu1 %283 }
 0x2ac   :  { %v205_v39 = vpop.permute.xlu0 %204 }
 0x2ad   :  { %2023 = vmatpush3.xpose.msk.msra.mxu1 %vm206_vm2, %v205_v39 }
 0x2ae   :  { %2027 = vmatprep.subr.mxu1 %v2319_v36 }
 0x2b0   :  { %2025 = vmatmul.mubr.msk.f32.vlgmr.msra.gmra.mrb[2].mxu1 %vm206_vm2, %v2473_v40 }
 0x2b1   :  { %2028 = vmatpush3.xpose.msk.msra.mxu1 %vm206_vm2, %v284_v41  ;;  %2029 = vmatprep.mubr.msk.f32.mxu1 %vm2320_vm1, %v2319_v36 }
 0x2b2   :  { %2037 = vmatprep.subr.mxu1 %v2319_v36 }
 0x2b4   :  { %2030 = vmatmul.mubr.msk.f32.vlgmr.msra.gmra.mrb[4].mxu1 %vm206_vm2, %v2482_v42 }
 0x2b5   :  { %2039 = vmatprep.mubr.msk.f32.mxu1 %vm2320_vm1, %v2319_v36 }
 0x383   :  { %v278_v43 = vpop.f32.mrb[2].mxu1 }
 0x384   :  { %v2026_v44 = vpop.f32.mrb[3].mxu1  ;;  %v360_v45 = vsel %vm206_vm2, %v278_v43, -inf }
 0x385   :  { %361 = vmax.xlane.f32.xlu1 %v360_v45 }
 0x387   :  { %v356_v46 = vpop.f32.mrb[4].mxu1 }
 0x388   :  { %v2031_v47 = vpop.f32.mrb[5].mxu1  ;;  %v363_v48 = vsel %vm206_vm2, %v356_v46, -inf }
 0x389   :  { %364 = vmax.xlane.f32.xlu0 %v363_v48 }
 0x396   :  { %458 = vrot.lane.b32.xlu1 %v2465_v37, %s2322_s2 }
 0x39a   :  { %538 = vrot.lane.b32.xlu1 %v2468_v38, %s2323_s24 }
 0x39e   :  { %616 = vrot.lane.b32.xlu1 %v2465_v37, %s2323_s24 }
 0x39f   :  { %382 = vrot.lane.b32.xlu0 %v2468_v38, %s2322_s2 }
 0x412   :  { %v362_v49 = vpop.xlane.xlu1 %361 }
 0x413   :  { %v366_v50 = vsub.f32 %v278_v43, %v362_v49 }
 0x415   :  { %v368_v51 = vmul.f32 1.442695, %v366_v50 }
 0x416   :  { %v459_v52 = vpop.permute.xlu1 %458  ;;  %v365_v53 = vpop.xlane.xlu0 %364 }
 0x417   :  { %2207 = vpow2.f32 %v368_v51  ;;  %v367_v54 = vsub.f32 %v356_v46, %v365_v53  ;;  %2038 = vmatpush3.msra.mxu1 %v459_v52 }
 0x418   :  { %2047 = vmatprep.subr.mxu1 %v2319_v36 }
 0x419   :  { %v370_v55 = vmul.f32 1.442695, %v367_v54 }
 0x41a   :  { %v383_v56 = vpop.permute.xlu0 %382  ;;  %v539_v61 = vpop.permute.xlu1 %538 }
 0x41b   :  { %2209 = vpow2.f32 %v370_v55  ;;  %2033 = vmatpush3.msra.mxu0 %v383_v56 }
 0x41c   :  { %2042 = vmatprep.subr.mxu0 %v2319_v36 }
 0x41e   :  { %v617_v62 = vpop.permute.xlu1 %616 }
 0x421   :  { %v2208_v57 = vpop.eup %2207 }
 0x422   :  { %v372_v58 = vsel %vm206_vm2, %v2208_v57, 0.0 }
 0x423   :  { %373 = vadd.xlane.f32.xlu0 %v372_v58 }
 0x425   :  { %v2210_v59 = vpop.eup %2209 }
 0x426   :  { %v375_v60 = vsel %vm206_vm2, %v2210_v59, 0.0 }
 0x427   :  { %376 = vadd.xlane.f32.xlu1 %v375_v60 }
 0x438   :  { %614 = vrot.lane.b32.xlu1 %v2482_v42, %s2324_s25 }
 0x439   :  { %536 = vrot.lane.b32.xlu0 %v2473_v40, %s2324_s25 }
 0x4b0   :  { %v374_v63 = vpop.xlane.xlu0 %373 }
 0x4b1   :  { %2211 = vrcp.f32 %v374_v63 }
 0x4b4   :  { %v377_v2 = vpop.xlane.xlu1 %376  ;;  %v537_v7 = vpop.permute.xlu0 %536 }
 0x4b5   :  { %2213 = vrcp.f32 %v377_v2 }
 0x4b8   :  { %v615_v8 = vpop.permute.xlu1 %614 }
 0x4bb   :  { %v2212_v3 = vpop.eup %2211 }
 0x4bc   :  { %v380_v4 = vmul.f32 %v2212_v3, %v2208_v57 }
 0x4be   :  { %2035 = vmatmul.mubr.msk.f32.vlgmr.msra.gmra.mrb[0].mxu0 %vm206_vm2, %v380_v4 }
 0x4bf   :  { %v2214_v5 = vpop.eup %2213  ;;  %2043 = vmatpush3.xpose.msk.msra.mxu0 %vm206_vm2, %v539_v61  ;;  %2044 = vmatprep.mubr.msk.f32.mxu0 %vm2320_vm1, %v2319_v36 }
 0x4c0   :  { %v381_v6 = vmul.f32 %v2214_v5, %v2210_v59  ;;  %2052 = vmatprep.subr.mxu0 %v2319_v36 }
 0x4c2   :  { %2040 = vmatmul.mubr.msk.f32.vlgmr.msra.gmra.mrb[6].mxu1 %vm206_vm2, %v381_v6  ;;  %2045 = vmatmul.mubr.msk.f32.vlgmr.msra.gmra.mrb[2].mxu0 %vm206_vm2, %v537_v7 }
 0x4c3   :  { %2048 = vmatpush3.xpose.msk.msra.mxu1 %vm206_vm2, %v617_v62  ;;  %2049 = vmatprep.mubr.msk.f32.mxu1 %vm2320_vm1, %v2319_v36 }
 0x4c4   :  { %2057 = vmatprep.subr.mxu1 %v2319_v36  ;;  %2054 = vmatprep.mubr.msk.f32.mxu0 %vm2320_vm1, %v2319_v36 }
 0x4c6   :  { %2050 = vmatmul.mubr.msk.f32.vlgmr.msra.gmra.mrb[8].mxu1 %vm206_vm2, %v615_v8 }
 0x4c7   :  { %2059 = vmatprep.mubr.msk.f32.mxu1 %vm2320_vm1, %v2319_v36 }
 0x591   :  { %v454_v9 = vpop.f32.mrb[0].mxu0 }
 0x592   :  { %534 = vst.msk [vmem:[#allocation2] sm:$0xff] %vm206_vm2, %v454_v9  ;;  %v2036_v10 = vpop.f32.mrb[1].mxu0 }
 0x595   :  { %v530_v11 = vpop.f32.mrb[6].mxu1  ;;  %v610_v12 = vpop.f32.mrb[2].mxu0 }
 0x596   :  { %535 = vst.msk [vmem:[#allocation2 + $0x8] sm:$0xff] %vm206_vm2, %v530_v11  ;;  %v2041_v13 = vpop.f32.mrb[7].mxu1  ;;  %v2046_v14 = vpop.f32.mrb[3].mxu0  ;;  %v692_v15 = vsel %vm206_vm2, %v610_v12, -inf }
 0x597   :  { %693 = vmax.xlane.f32.xlu0 %v692_v15 }
 0x599   :  { %v688_v16 = vpop.f32.mrb[8].mxu1 }
 0x59a   :  { %v2051_v17 = vpop.f32.mrb[9].mxu1  ;;  %v695_v18 = vsel %vm206_vm2, %v688_v16, -inf }
 0x59b   :  { %696 = vmax.xlane.f32.xlu1 %v695_v18 }
 0x5ac   :  { %790 = vrot.lane.b32.xlu1 %v2465_v37, %s2325_s26 }
 0x5ad   :  { %714 = vrot.lane.b32.xlu0 %v2468_v38, %s2325_s26 }
 0x5b0   :  { %879 = vrot.lane.b32.xlu1 %v2468_v38, %s2326_s27 }
 0x5b4   :  { %957 = vrot.lane.b32.xlu1 %v2465_v37, %s2326_s27 }
 0x5b8   :  { %955 = vrot.lane.b32.xlu1 %v2482_v42, %s2327_s0 }
 0x624   :  { %v694_v19 = vpop.xlane.xlu0 %693 }
 0x625   :  { %v698_v20 = vsub.f32 %v610_v12, %v694_v19 }
 0x627   :  { %v700_v21 = vmul.f32 1.442695, %v698_v20 }
 0x628   :  { %v715_v22 = vpop.permute.xlu0 %714  ;;  %v697_v23 = vpop.xlane.xlu1 %696 }
 0x629   :  { %2215 = vpow2.f32 %v700_v21  ;;  %v699_v24 = vsub.f32 %v688_v16, %v697_v23  ;;  %2053 = vmatpush3.msra.mxu0 %v715_v22 }
 0x62a   :  { %2062 = vmatprep.subr.mxu0 %v2319_v36 }
 0x62b   :  { %v702_v25 = vmul.f32 1.442695, %v699_v24 }
 0x62c   :  { %v791_v26 = vpop.permute.xlu1 %790 }
 0x62d   :  { %2217 = vpow2.f32 %v702_v25  ;;  %2058 = vmatpush3.msra.mxu1 %v791_v26 }
 0x62e   :  { %2067 = vmatprep.subr.mxu1 %v2319_v36 }
 0x630   :  { %v880_v33 = vpop.permute.xlu1 %879 }
 0x633   :  { %v2216_v27 = vpop.eup %2215 }
 0x634   :  { %v704_v28 = vsel %vm206_vm2, %v2216_v27, 0.0  ;;  %v958_v41 = vpop.permute.xlu1 %957 }
 0x635   :  { %705 = vadd.xlane.f32.xlu0 %v704_v28 }
 0x637   :  { %v2218_v29 = vpop.eup %2217 }
 0x638   :  { %v707_v30 = vsel %vm206_vm2, %v2218_v29, 0.0  ;;  %v956_v45 = vpop.permute.xlu1 %955 }
 0x639   :  { %708 = vadd.xlane.f32.xlu0 %v707_v30 }
 0x64f   :  { %877 = vrot.lane.b32.xlu0 %v2473_v40, %s2327_s0 }
 0x6c2   :  { %v706_v31 = vpop.xlane.xlu0 %705 }
 0x6c3   :  { %2219 = vrcp.f32 %v706_v31 }
 0x6c6   :  { %v709_v32 = vpop.xlane.xlu0 %708 }
 0x6c7   :  { %2221 = vrcp.f32 %v709_v32 }
 0x6ca   :  { %v878_v44 = vpop.permute.xlu0 %877 }
 0x6cd   :  { %v2220_v34 = vpop.eup %2219 }
 0x6ce   :  { %v712_v35 = vmul.f32 %v2220_v34, %v2216_v27 }
 0x6d0   :  { %2055 = vmatmul.mubr.msk.f32.vlgmr.msra.gmra.mrb[4].mxu0 %vm206_vm2, %v712_v35 }
 0x6d1   :  { %v2222_v39 = vpop.eup %2221  ;;  %2063 = vmatpush3.xpose.msk.msra.mxu0 %vm206_vm2, %v880_v33  ;;  %2064 = vmatprep.mubr.msk.f32.mxu0 %vm2320_vm1, %v2319_v36 }
 0x6d2   :  { %v713_v43 = vmul.f32 %v2222_v39, %v2218_v29  ;;  %2072 = vmatprep.subr.mxu0 %v2319_v36 }
 0x6d4   :  { %2060 = vmatmul.mubr.msk.f32.vlgmr.msra.gmra.mrb[10].mxu1 %vm206_vm2, %v713_v43  ;;  %2065 = vmatmul.mubr.msk.f32.vlgmr.msra.gmra.mrb[6].mxu0 %vm206_vm2, %v878_v44 }
 0x6d5   :  { %2068 = vmatpush3.xpose.msk.msra.mxu1 %vm206_vm2, %v958_v41  ;;  %2069 = vmatprep.mubr.msk.f32.mxu1 %vm2320_vm1, %v2319_v36 }
 0x6d6   :  { %2077 = vmatprep.subr.mxu1 %v2319_v36  ;;  %2074 = vmatprep.mubr.msk.f32.mxu0 %vm2320_vm1, %v2319_v36 }
 0x6d8   :  { %2070 = vmatmul.mubr.msk.f32.vlgmr.msra.gmra.mrb[12].mxu1 %vm206_vm2, %v956_v45 }
 0x6d9   :  { %2079 = vmatprep.mubr.msk.f32.mxu1 %vm2320_vm1, %v2319_v36 }
 0x7a3   :  { %v2547_v46 = vpop.f32.mrb[4].mxu0 }
 0x7a4   :  { %v2056_v47 = vpop.f32.mrb[5].mxu0 }
 0x7a7   :  { %v2549_v48 = vpop.f32.mrb[10].mxu1  ;;  %v951_v49 = vpop.f32.mrb[6].mxu0 }
 0x7a8   :  { %v2061_v50 = vpop.f32.mrb[11].mxu1  ;;  %v2066_v51 = vpop.f32.mrb[7].mxu0  ;;  %v1033_v52 = vsel %vm206_vm2, %v951_v49, -inf }
 0x7a9   :  { %1034 = vmax.xlane.f32.xlu0 %v1033_v52  ;;  %v1563_v51 = vld [vmem:[%s2694_s4 + $0x10] sm:$0xff]  ;;  %v1564_v52 = vld [vmem:[%s2694_s4 + $0x18] sm:$0xff] }
 0x7ab   :  { %v1029_v53 = vpop.f32.mrb[12].mxu1 }
 0x7ac   :  { %v2071_v54 = vpop.f32.mrb[13].mxu1  ;;  %v1036_v55 = vsel %vm206_vm2, %v1029_v53, -inf }
 0x7ad   :  { %1037 = vmax.xlane.f32.xlu1 %v1036_v55 }
 0x7be   :  { %1131 = vrot.lane.b32.xlu1 %v2465_v37, %s2328_s22 }
 0x7bf   :  { %1055 = vrot.lane.b32.xlu0 %v2468_v38, %s2328_s22 }
 0x7c2   :  { %1220 = vrot.lane.b32.xlu1 %v2468_v38, %s2329_s28 }
 0x7c6   :  { %1298 = vrot.lane.b32.xlu1 %v2465_v37, %s2329_s28 }
 0x7ca   :  { %1296 = vrot.lane.b32.xlu1 %v2482_v42, %s2330_s9 }
 0x836   :  { %v1035_v56 = vpop.xlane.xlu0 %1034 }
 0x837   :  { %v1039_v57 = vsub.f32 %v951_v49, %v1035_v56  ;;  %v1562_v49 = vld [vmem:[%s2694_s4 + $0x8] sm:$0xff] }
 0x839   :  { %v1041_v58 = vmul.f32 1.442695, %v1039_v57 }
 0x83a   :  { %v1056_v59 = vpop.permute.xlu0 %1055  ;;  %v1038_v60 = vpop.xlane.xlu1 %1037 }
 0x83b   :  { %2223 = vpow2.f32 %v1041_v58  ;;  %v1040_v61 = vsub.f32 %v1029_v53, %v1038_v60  ;;  %2073 = vmatpush3.msra.mxu0 %v1056_v59  ;;  %v2155_v53 = vpack.c.bf16 %v1564_v52, %v1563_v51  ;;  %v1945_v51 = vld [vmem:[#allocation6] ss:$0 sm:$0xff] }
 0x83c   :  { %2082 = vmatprep.subr.mxu0 %v2319_v36 }
 0x83d   :  { %v1043_v62 = vmul.f32 1.442695, %v1040_v61 }
 0x83e   :  { %v1132_v63 = vpop.permute.xlu1 %1131 }
 0x83f   :  { %2225 = vpow2.f32 %v1043_v62  ;;  %2078 = vmatpush3.msra.mxu1 %v1132_v63  ;;  %v1940_v62 = vld [vmem:[%s2695_s5] ss:$0 sm:$0xff] }
 0x840   :  { %2087 = vmatprep.subr.mxu1 %v2319_v36 }
 0x842   :  { %v1221_v7 = vpop.permute.xlu1 %1220 }
 0x845   :  { %v2224_v2 = vpop.eup %2223 }
 0x846   :  { %v1045_v3 = vsel %vm206_vm2, %v2224_v2, 0.0  ;;  %v1299_v11 = vpop.permute.xlu1 %1298 }
 0x847   :  { %1046 = vadd.xlane.f32.xlu0 %v1045_v3 }
 0x849   :  { %v2226_v42 = vpop.eup %2225 }
 0x84a   :  { %v1048_v4 = vsel %vm206_vm2, %v2226_v42, 0.0  ;;  %v1297_v13 = vpop.permute.xlu1 %1296 }
 0x84b   :  { %1049 = vadd.xlane.f32.xlu0 %v1048_v4 }
 0x861   :  { %1218 = vrot.lane.b32.xlu0 %v2473_v40, %s2330_s9 }
 0x8d4   :  { %v1047_v5 = vpop.xlane.xlu0 %1046 }
 0x8d5   :  { %2227 = vrcp.f32 %v1047_v5 }
 0x8d8   :  { %v1050_v6 = vpop.xlane.xlu0 %1049 }
 0x8d9   :  { %2229 = vrcp.f32 %v1050_v6 }
 0x8dc   :  { %v1219_v40 = vpop.permute.xlu0 %1218 }
 0x8df   :  { %v2228_v8 = vpop.eup %2227 }
 0x8e0   :  { %v1053_v9 = vmul.f32 %v2228_v8, %v2224_v2 }
 0x8e2   :  { %2075 = vmatmul.mubr.msk.f32.vlgmr.msra.gmra.mrb[8].mxu0 %vm206_vm2, %v1053_v9 }
 0x8e3   :  { %v2230_v10 = vpop.eup %2229  ;;  %2083 = vmatpush3.xpose.msk.msra.mxu0 %vm206_vm2, %v1221_v7  ;;  %2084 = vmatprep.mubr.msk.f32.mxu0 %vm2320_vm1, %v2319_v36 }
 0x8e4   :  { %v1054_v12 = vmul.f32 %v2230_v10, %v2226_v42  ;;  %2092 = vmatprep.subr.mxu0 %v2319_v36 }
 0x8e6   :  { %2080 = vmatmul.mubr.msk.f32.vlgmr.msra.gmra.mrb[14].mxu1 %vm206_vm2, %v1054_v12  ;;  %2085 = vmatmul.mubr.msk.f32.vlgmr.msra.gmra.mrb[10].mxu0 %vm206_vm2, %v1219_v40 }
 0x8e7   :  { %2088 = vmatpush3.xpose.msk.msra.mxu1 %vm206_vm2, %v1299_v11  ;;  %2089 = vmatprep.mubr.msk.f32.mxu1 %vm2320_vm1, %v2319_v36 }
 0x8e8   :  { %2097 = vmatprep.subr.mxu1 %v2319_v36  ;;  %2094 = vmatprep.mubr.msk.f32.mxu0 %vm2320_vm1, %v2319_v36 }
 0x8ea   :  { %2090 = vmatmul.mubr.msk.f32.vlgmr.msra.gmra.mrb[16].mxu1 %vm206_vm2, %v1297_v13 }
 0x8eb   :  { %2099 = vmatprep.mubr.msk.f32.mxu1 %vm2320_vm1, %v2319_v36 }
 0x9b5   :  { %v1127_v14 = vpop.f32.mrb[8].mxu0 }
 0x9b6   :  { %v2076_v15 = vpop.f32.mrb[9].mxu0 }
 0x9b7   :  { %v1699_v15 = vld [vmem:[%s2698_s8] sm:$0xff] }
 0x9b9   :  { %v1203_v16 = vpop.f32.mrb[14].mxu1  ;;  %v1292_v17 = vpop.f32.mrb[10].mxu0 }
 0x9ba   :  { %v2081_v18 = vpop.f32.mrb[15].mxu1  ;;  %v2086_v19 = vpop.f32.mrb[11].mxu0  ;;  %v1374_v20 = vsel %vm206_vm2, %v1292_v17, -inf }
 0x9bb   :  { %1375 = vmax.xlane.f32.xlu0 %v1374_v20  ;;  %v1701_v18 = vld [vmem:[%s2698_s8 + $0x10] sm:$0xff]  ;;  %v1702_v19 = vld [vmem:[%s2698_s8 + $0x18] sm:$0xff] }
 0x9bc   :  { %v2163_v20 = vpack.c.bf16 %v1702_v19, %v1701_v18 }
 0x9bd   :  { %v1370_v21 = vpop.f32.mrb[16].mxu1 }
 0x9be   :  { %v2091_v22 = vpop.f32.mrb[17].mxu1  ;;  %v1377_v23 = vsel %vm206_vm2, %v1370_v21, -inf }
 0x9bf   :  { %1378 = vmax.xlane.f32.xlu1 %v1377_v23  ;;  %v1794_v22 = vld [vmem:[%s2700_s10 + $0x8] sm:$0xff]  ;;  %v1795_v23 = vld [vmem:[%s2700_s10 + $0x10] sm:$0xff] }
 0x9d0   :  { %1472 = vrot.lane.b32.xlu1 %v2465_v37, %s2331_s29 }
 0x9d4   :  { %868 = vrot.lane.b32.xlu1 %v2547_v46, %s2317_s14 }
 0x9d8   :  { %870 = vrot.lane.b32.xlu1 %v2549_v48, %s2317_s14 }
 0x9dc   :  { %1211 = vrot.lane.b32.xlu1 %v1203_v16, %s2332_s30  ;;  %v1700_v16 = vld [vmem:[%s2698_s8 + $0x8] sm:$0xff] }
 0xa48   :  { %v1376_v36 = vpop.xlane.xlu0 %1375 }
 0xa49   :  { %v1380_v24 = vsub.f32 %v1292_v17, %v1376_v36  ;;  %v2159_v17 = vpack.c.bf16 %v1700_v16, %v1699_v15 }
 0xa4b   :  { %v1382_v25 = vmul.f32 1.442695, %v1380_v24  ;;  %v1796_v24 = vld [vmem:[%s2700_s10 + $0x18] sm:$0xff] }
 0xa4c   :  { %v1379_v26 = vpop.xlane.xlu1 %1378 }
 0xa4d   :  { %2231 = vpow2.f32 %v1382_v25  ;;  %v1381_v27 = vsub.f32 %v1370_v21, %v1379_v26  ;;  %v1793_v21 = vld [vmem:[%s2700_s10] sm:$0xff]  ;;  %v2171_v25 = vpack.c.bf16 %v1796_v24, %v1795_v23 }
 0xa4e   :  { %v2167_v36 = vpack.c.bf16 %v1794_v22, %v1793_v21  ;;  %v1797_v26 = vld [vmem:[%s2700_s10 + $0x20] sm:$0xff] }
 0xa4f   :  { %v1384_v28 = vmul.f32 1.442695, %v1381_v27  ;;  %v1798_v27 = vld [vmem:[%s2700_s10 + $0x28] sm:$0xff] }
 0xa50   :  { %v1473_v29 = vpop.permute.xlu1 %1472 }
 0xa51   :  { %2233 = vpow2.f32 %v1384_v28  ;;  %2098 = vmatpush3.msra.mxu1 %v1473_v29  ;;  %v2175_v28 = vpack.c.bf16 %v1798_v27, %v1797_v26 }
 0xa52   :  { %2160 = vmatprep.subr.bf16.mxu1 %v2159_v17 }
 0xa54   :  { %v869_v37 = vpop.permute.xlu1 %868 }
 0xa55   :  { %875 = vst.msk [vmem:[#allocation2] sm:$0xff] %vm874_vm3, %v869_v37 }
 0xa57   :  { %v2232_v30 = vpop.eup %2231 }
 0xa58   :  { %v871_v31 = vpop.permute.xlu1 %870  ;;  %v1386_v32 = vsel %vm206_vm2, %v2232_v30, 0.0 }
 0xa59   :  { %876 = vst.msk [vmem:[#allocation2 + $0x8] sm:$0xff] %vm874_vm3, %v871_v31  ;;  %1387 = vadd.xlane.f32.xlu0 %v1386_v32 }
 0xa5b   :  { %v2234_v33 = vpop.eup %2233 }
 0xa5c   :  { %v1212_v34 = vpop.permute.xlu1 %1211  ;;  %v1389_v35 = vsel %vm206_vm2, %v2234_v33, 0.0 }
 0xa5d   :  { %1217 = vst.msk [vmem:[#allocation2 + $0x8] sm:$0xff] %vm1215_vm4, %v1212_v34  ;;  %1390 = vadd.xlane.f32.xlu0 %v1389_v35  ;;  %v1943_v35 = vld [vmem:[%s2696_s6] ss:$0 sm:$0xff] }
 0xa73   :  { %1396 = vrot.lane.b32.xlu0 %v2468_v38, %s2331_s29  ;;  %v1561_v38 = vld [vmem:[%s2694_s4] sm:$0xff] }
 0xa74   :  { %v2151_v50 = vpack.c.bf16 %v1562_v49, %v1561_v38  ;;  %v1799_v38 = vld [vmem:[%s2700_s10 + $0x30] sm:$0xff]  ;;  %v1800_v49 = vld [vmem:[%s2700_s10 + $0x38] sm:$0xff]  ;;  %s2334_s10 = smov [#allocation8]  }
 0xa75   :  { %s1899_s26 = sshll.u32 %s2334_s10, 4  ;;  %s1900_s26 = int_to_ptr.vmem [resolvable:$true] %s1899_s26 }
 0xa76   :  { %s2287_s27 = scalar_lea.vmem %s1900_s26, 256  ;;  %p2292_p3 = scmp.lt.s32.totalorder %s1900_s26, %s1900_s26 }
 0xa77   :  { %1209 = vrot.lane.b32.xlu0 %v1127_v14, %s2332_s30  ;;  %p2288_p2 = scmp.ne.s32.totalorder %s1900_s26, %s2287_s27  ;;  %p2293_p4 = scmp.lt.s32.totalorder %s2287_s27, %s2287_s27 }
 0xa79   :  { %p2294_p5 = por %p2293_p4, %p2292_p3 }
 0xa7b   :  { %p2295_p6 = pnand %p2294_p5, %p2288_p2 }
 0xae6   :  { %v1388_v39 = vpop.xlane.xlu0 %1387 }
 0xae7   :  { %2235 = vrcp.f32 %v1388_v39 }
 0xaea   :  { %v1391_v41 = vpop.xlane.xlu0 %1390 }
 0xaeb   :  { %2237 = vrcp.f32 %v1391_v41  ;;  %v1944_v41 = vld [vmem:[%s2697_s7] ss:$0 sm:$0xff] }
 0xaee   :  { %v1397_v43 = vpop.permute.xlu0 %1396 }
 0xaef   :  { %2093 = vmatpush3.msra.mxu0 %v1397_v43 }
 0xaf0   :  { %2152 = vmatprep.subr.bf16.mxu0 %v2151_v50 }
 0xaf1   :  { %v2236_v44 = vpop.eup %2235 }
 0xaf2   :  { %v1394_v45 = vmul.f32 %v2236_v44, %v2232_v30  ;;  %v1210_v46 = vpop.permute.xlu0 %1209 }
 0xaf3   :  { %1216 = vst.msk [vmem:[#allocation2] sm:$0xff] %vm1215_vm4, %v1210_v46 }
 0xaf4   :  { %2095 = vmatmul.mubr.msk.f32.vlgmr.msra.gmra.mrb[12].mxu0 %vm206_vm2, %v1394_v45 }
 0xaf5   :  { %v2238_v47 = vpop.eup %2237  ;;  %2154 = vmatpush3.bf16.msra.mxu0 %v2151_v50  ;;  %v2179_v50 = vpack.c.bf16 %v1800_v49, %v1799_v38 }
 0xaf6   :  { %v1395_v48 = vmul.f32 %v2238_v47, %v2234_v33  ;;  %2156 = vmatprep.subr.bf16.mxu0 %v2155_v53 }
 0xaf8   :  { %2100 = vmatmul.mubr.msk.f32.vlgmr.msra.gmra.mrb[18].mxu1 %vm206_vm2, %v1395_v48 }
 0xaf9   :  { %2158 = vmatpush3.bf16.msra.mxu0 %v2155_v53  ;;  %2162 = vmatpush3.bf16.msra.mxu1 %v2159_v17 }
 0xafa   :  { %2164 = vmatprep.subr.bf16.mxu1 %v2163_v20  ;;  %2168 = vmatprep.subr.bf16.mxu0 %v2167_v36 }
 0xafd   :  { %2166 = vmatpush3.bf16.msra.mxu1 %v2163_v20 }
 0xbc7   :  { %v1468_v54 = vpop.f32.mrb[12].mxu0 }
 0xbc8   :  { %1550 = vrot.lane.b32.xlu0 %v1468_v54, %s2333_s23  ;;  %v2096_v55 = vpop.f32.mrb[13].mxu0 }
 0xbcb   :  { %v1544_v56 = vpop.f32.mrb[18].mxu1 }
 0xbcc   :  { %1552 = vrot.lane.b32.xlu1 %v1544_v56, %s2333_s23  ;;  %v2101_v57 = vpop.f32.mrb[19].mxu1 }
 0xc3a   :  { %v1551_v58 = vpop.permute.xlu0 %1550 }
 0xc3b   :  { %1557 = vst.msk [vmem:[#allocation2] sm:$0xff] %vm1556_vm5, %v1551_v58  ;;  %v1948_v58 = vld [vmem:[%s2701_s11] ss:$0 sm:$0xff] }
 0xc3e   :  { %v1553_v59 = vpop.permute.xlu1 %1552 }
 0xc3f   :  { %1558 = vst.msk [vmem:[#allocation2 + $0x8] sm:$0xff] %vm1556_vm5, %v1553_v59 }
 0xc42   :  { %v1559_v60 = vld [vmem:[#allocation2] sm:$0xff] }
 0xc43   :  { %2110 = vmatprep.mubr.msk.f32.mxu0 %vm70_vm0, %v1559_v60 }
 0xc46   :  { %v1560_v61 = vld [vmem:[#allocation2 + $0x8] sm:$0xff] }
 0xc47   :  { %2111 = vmatmul.mubr.msk.f32.vlgmr.msra.gmra.mrb[14].mxu0 %vm70_vm0, %v1560_v61 }
 0xc48   :  { %2170 = vmatpush3.bf16.msra.mxu0 %v2167_v36 }
 0xc49   :  { %2172 = vmatprep.subr.bf16.mxu0 %v2171_v25 }
 0xc4c   :  { %2174 = vmatpush3.bf16.msra.mxu0 %v2171_v25 }
 0xc4d   :  { %2176 = vmatprep.subr.bf16.mxu0 %v2175_v28 }
 0xc50   :  { %2178 = vmatpush3.bf16.msra.mxu0 %v2175_v28 }
 0xc51   :  { %2180 = vmatprep.subr.bf16.mxu0 %v2179_v50 }
 0xc54   :  { %2182 = vmatpush3.bf16.msra.mxu0 %v2179_v50 }
 0xd1a   :  { %v2112_v63 = vpop.f32.mrb[14].mxu0 }
 0xd1b   :  { %v1650_v2 = vadd.f32 %v2112_v63, %v1940_v62  ;;  %v1644_v3 = vpop.f32.mrb[15].mxu0 }
 0xd1c   :  { %v1645_v42 = vadd.f32 %v1940_v62, %v1644_v3 }
 0xd1d   :  { %v2611_v4 = vadd.f32 %v1650_v2, %v2429_v1 }
 0xd1e   :  { %v2614_v5 = vadd.f32 %v1645_v42, %v2427_v0 }
 0xd1f   :  { %v1658_v6 = vsel %vm70_vm0, %v2611_v4, 0.0 }
 0xd20   :  { %1659 = vadd.xlane.f32.xlu1 %v1658_v6  ;;  %v1655_v7 = vsel %vm70_vm0, %v2614_v5, 0.0 }
 0xd21   :  { %1656 = vadd.xlane.f32.xlu0 %v1655_v7 }
 0xdad   :  { %v1660_v8 = vpop.xlane.xlu1 %1659 }
 0xdae   :  { %v1662_v9 = vmul.f32 0.03125, %v1660_v8  ;;  %v1657_v10 = vpop.xlane.xlu0 %1656 }
 0xdaf   :  { %v1661_v11 = vmul.f32 0.03125, %v1657_v10 }
 0xdb0   :  { %v1664_v12 = vsub.f32 %v2611_v4, %v1662_v9 }
 0xdb1   :  { %v1663_v1 = vsub.f32 %v2614_v5, %v1661_v11 }
 0xdb2   :  { %v1666_v13 = vmul.f32 %v1664_v12, %v1664_v12 }
 0xdb3   :  { %v1665_v40 = vmul.f32 %v1663_v1, %v1663_v1 }
 0xdb4   :  { %v1670_v14 = vsel %vm70_vm0, %v1666_v13, 0.0 }
 0xdb5   :  { %v1667_v0 = vsel %vm70_vm0, %v1665_v40, 0.0 }
 0xdb6   :  { %1668 = vadd.xlane.f32.xlu0 %v1667_v0 }
 0xdba   :  { %1671 = vadd.xlane.f32.xlu0 %v1670_v14 }
 0xe43   :  { %v1669_v29 = vpop.xlane.xlu0 %1668 }
 0xe44   :  { %v1673_v37 = vmul.f32 0.03125, %v1669_v29 }
 0xe46   :  { %v1675_v30 = vadd.f32 1e-05, %v1673_v37 }
 0xe47   :  { %v1672_v31 = vpop.xlane.xlu0 %1671 }
 0xe48   :  { %2239 = vrsqrt.f32 %v1675_v30  ;;  %v1674_v32 = vmul.f32 0.03125, %v1672_v31 }
 0xe4a   :  { %v1676_v33 = vadd.f32 1e-05, %v1674_v32 }
 0xe4c   :  { %2241 = vrsqrt.f32 %v1676_v33 }
 0xe52   :  { %v2240_v34 = vpop.eup %2239 }
 0xe53   :  { %v1679_v39 = vmul.f32 %v2240_v34, %v1663_v1 }
 0xe55   :  { %v1688_v43 = vmul.f32 %v1943_v35, %v1679_v39 }
 0xe56   :  { %v2242_v44 = vpop.eup %2241 }
 0xe57   :  { %v1680_v45 = vmul.f32 %v2242_v44, %v1664_v12  ;;  %v1697_v46 = vadd.f32 %v1944_v41, %v1688_v43 }
 0xe59   :  { %v1689_v47 = vmul.f32 %v1943_v35, %v1680_v45  ;;  %2121 = vmatprep.mubr.msk.f32.mxu1 %vm70_vm0, %v1697_v46 }
 0xe5b   :  { %v1698_v48 = vadd.f32 %v1944_v41, %v1689_v47 }
 0xe5d   :  { %2122 = vmatmul.mubr.msk.f32.vlgmr.msra.gmra.mrb[20].mxu1 %vm70_vm0, %v1698_v48 }
 0xf30   :  { %v2123_v52 = vpop.f32.mrb[20].mxu1 }
 0xf31   :  { %v1788_v53 = vadd.f32 %v2123_v52, %v1945_v51  ;;  %v1782_v54 = vpop.f32.mrb[21].mxu1 }
 0xf32   :  { %v1783_v55 = vadd.f32 %v1945_v51, %v1782_v54 }
 0xf33   :  { %v1792_v57 = vmax.f32 %v1788_v53, 0.0 }
 0xf34   :  { %v1791_v56 = vmax.f32 %v1783_v55, 0.0 }
 0xf36   :  { %2140 = vmatprep.mubr.msk.f32.mxu0 %vm1808_vm6, %v1791_v56 }
 0xf37   :  { %2141 = vmatmul.mubr.msk.f32.vlgmr.msra.gmra.mrb[16].mxu0 %vm1808_vm6, %v1792_v57 }
0x100a   :  { %v2142_v59 = vpop.f32.mrb[16].mxu0 }
0x100b   :  { %v1887_v60 = vadd.f32 %v2142_v59, %v1948_v58  ;;  %v1881_v61 = vpop.f32.mrb[17].mxu0 }
0x100c   :  { %v1882_v62 = vadd.f32 %v1948_v58, %v1881_v61 }
0x100d   :  { %v1891_v63 = vadd.f32 %v1887_v60, %v2611_v4 }
0x100e   :  { %v1890_v2 = vadd.f32 %v1882_v62, %v2614_v5 }
0x100f   :  { %1893 = vst.msk [vmem:[#allocation8 + $0x8] sm:$0xff] %vm70_vm0, %v1891_v63 }
0x1010   :  { %1892 = vst.msk [vmem:[#allocation8] sm:$0xff] %vm70_vm0, %v1890_v2 }
0x1011   :  { %2298 = shalt.err (!%p2295_p6)
}
0x1012   :  { %s2299_s22 = scalar_lea.hbm %s2702_s12, 256 }
0x1013   :  { %p2300_p7 = scmp.ne.s32.totalorder %s2702_s12, %s2299_s22  ;;  %p2303_p8 = scmp.lt.u32.totalorder %s2299_s22, %s2702_s12 }
0x1015   :  { %p2305_p9 = pnand %p2303_p8, %p2300_p7 }
0x1017   :  { %2308 = shalt.err (!%p2305_p9)
}
0x1018   :  { %1905 = dma.vmem_to_hbm [thread:$0]  %s1900_s26, 256, %s2702_s12, [#allocation5], %s2316_s13, %s2316_s13, %s2317_s14  }
0x1019   :  { %2313 = dma.done.wait [#allocation5], 256  }
0x101a   :  { %2314 = vsyncadd [#allocation5], 4294967040 }
0x101b   :  { %1909 = vsyncpa [#allocation4], 1 }
0x101c   :  { %1910 = vsyncpa [#allocation7], 1 }
0x101d   :  { %1911 = vsyncpa [#allocation5], 1 }

</bundles_post_ra>
